<compile_context>
chip_gen: v7x
topology: tpu7x:2x2x1
jax: 0.10.0
libtpu: 0.0.40
codegen_flags: <defaults>
</compile_context>

<pallas_src>
import functools

import jax
import jax.numpy as jnp
from jax.experimental import pallas as pl
from jax.experimental.pallas import tpu as pltpu


LANE = 128          # lane width (last-dim padding target)
SUBLANE_BF16 = 16   # bf16 packs 16 rows per vreg tile; batch tile multiple


def _round_up(n, m):
    return ((n + m - 1) // m) * m


def _actor_kernel(x_ref, w1_ref, b1_ref, w2_ref, b2_ref, w3_ref, b3_ref,
                  o_ref, *, amax):
    # x_ref: (TILE_B, Sp) bf16; weights bf16 (in, out); biases f32 (1, dim);
    # out f32 (TILE_B, Ap).
    x = x_ref[...]

    # Layer 1: Linear + ReLU (bf16 x bf16 -> f32 accumulate on the MXU)
    h1 = jnp.dot(x, w1_ref[...], preferred_element_type=jnp.float32) + b1_ref[...]
    h1 = jnp.maximum(h1, 0.0)

    # Layer 2: Linear + ReLU
    h2 = jnp.dot(h1.astype(jnp.bfloat16), w2_ref[...],
                 preferred_element_type=jnp.float32) + b2_ref[...]
    h2 = jnp.maximum(h2, 0.0)

    # Layer 3: Linear + Tanh, scaled by amax (EUP tanh + VPU mul: free filler)
    y = jnp.dot(h2.astype(jnp.bfloat16), w3_ref[...],
                preferred_element_type=jnp.float32) + b3_ref[...]
    o_ref[...] = jnp.tanh(y) * amax


def prepare_actor_params(params):
    """One-time padding + bf16 cast (hoisted out of the per-call path).
    Weights stored as (in, out). Returns (padded_params, dims) with dims a
    hashable tuple of Python ints (static under jit)."""
    w1, b1 = params["w1"], params["b1"]
    w2, b2 = params["w2"], params["b2"]
    w3, b3 = params["w3"], params["b3"]

    state_dim, h1_dim = w1.shape
    h2_dim = w2.shape[1]
    action_dim = w3.shape[1]

    Sp = _round_up(state_dim, LANE)
    H1p = _round_up(h1_dim, LANE)
    H2p = _round_up(h2_dim, LANE)
    Ap = _round_up(action_dim, LANE)

    def padw(a, r, c):
        a = a.astype(jnp.float32)
        a = jnp.pad(a, ((0, r - a.shape[0]), (0, c - a.shape[1])))
        return a.astype(jnp.bfloat16)

    def padb(a, c):
        a = a.astype(jnp.float32).reshape(1, -1)
        return jnp.pad(a, ((0, 0), (0, c - a.shape[1])))

    padded = {
        "w1": padw(w1, Sp, H1p), "b1": padb(b1, H1p),
        "w2": padw(w2, H1p, H2p), "b2": padb(b2, H2p),
        "w3": padw(w3, H2p, Ap), "b3": padb(b3, Ap),
    }
    dims = (state_dim, action_dim, Sp, H1p, H2p, Ap)
    return padded, dims


@functools.partial(jax.jit, static_argnames=("dims", "amax"))
def actor_forward(state, padded, dims, amax=100.0):
    """state: (B, state_dim) f32. padded/dims from prepare_actor_params.
    Returns (B, action_dim) f32."""
    state_dim, action_dim, Sp, H1p, H2p, Ap = dims
    B = state.shape[0]

    # Batch tile: 256 rows keeps the 256-wide MXU (v6e/v7x) full; small batches
    # use one lane-packed tile. Always a multiple of 16 (bf16 sublane packing).
    if B >= 256:
        tile_b = 256
    else:
        tile_b = _round_up(max(B, 1), SUBLANE_BF16)
    Bp = _round_up(B, tile_b)

    x_p = jnp.pad(state.astype(jnp.bfloat16),
                  ((0, Bp - B), (0, Sp - state_dim)))

    resident = lambda i: (0, 0)   # weights/biases: same block every grid step

    out_p = pl.pallas_call(
        functools.partial(_actor_kernel, amax=float(amax)),
        out_shape=jax.ShapeDtypeStruct((Bp, Ap), jnp.float32),
        grid=(Bp // tile_b,),
        in_specs=[
            pl.BlockSpec((tile_b, Sp), lambda i: (i, 0)),   # x (streamed)
            pl.BlockSpec((Sp, H1p), resident),              # w1
            pl.BlockSpec((1, H1p), resident),               # b1
            pl.BlockSpec((H1p, H2p), resident),             # w2
            pl.BlockSpec((1, H2p), resident),               # b2
            pl.BlockSpec((H2p, Ap), resident),              # w3
            pl.BlockSpec((1, Ap), resident),                # b3
        ],
        out_specs=pl.BlockSpec((tile_b, Ap), lambda i: (i, 0)),
        compiler_params=pltpu.CompilerParams(
            dimension_semantics=("parallel",)),             # megacore on v7x
    )(x_p, padded["w1"], padded["b1"], padded["w2"], padded["b2"],
      padded["w3"], padded["b3"])

    return out_p[:B, :action_dim]


def init_actor_params(key, state_dim, action_dim):
    """Deterministic init mimicking PyTorch nn.Linear default:
    U(-1/sqrt(fan_in), 1/sqrt(fan_in)). Weights stored as (in, out)."""
    dims = [(state_dim, 30), (30, 20), (20, action_dim)]
    params = {}
    for i, (fan_in, fan_out) in enumerate(dims, start=1):
        key, kw, kb = jax.random.split(key, 3)
        bound = 1.0 / (fan_in ** 0.5)
        params[f"w{i}"] = jax.random.uniform(
            kw, (fan_in, fan_out), jnp.float32, -bound, bound)
        params[f"b{i}"] = jax.random.uniform(
            kb, (fan_out,), jnp.float32, -bound, bound)
    return params


def actor_reference(state, params, amax=100.0):
    """Pure-JAX f32 reference for verification."""
    h1 = jnp.maximum(state @ params["w1"] + params["b1"], 0.0)
    h2 = jnp.maximum(h1 @ params["w2"] + params["b2"], 0.0)
    return jnp.tanh(h2 @ params["w3"] + params["b3"]) * amax


if __name__ == "__main__":
    key = jax.random.PRNGKey(0)
    state_dim, action_dim, batch = 8, 4, 2
    amax = 100.0

    k_params, k_state, k_big = jax.random.split(key, 3)
    params = init_actor_params(k_params, state_dim, action_dim)
    padded, dims = prepare_actor_params(params)   # pad/cast weights ONCE

    # Small-batch check (tolerances account for bf16 inputs/weights vs the
    # f32 reference; the *amax=100 scale amplifies absolute error).
    state = jax.random.normal(k_state, (batch, state_dim), jnp.float32)
    out = jax.block_until_ready(actor_forward(state, padded, dims, amax=amax))
    ref = actor_reference(state, params, amax=amax)
    assert out.shape == (batch, action_dim)
    assert jnp.allclose(out, ref, rtol=5e-2, atol=1.0), (out, ref)

    # Large-batch check: exercises the batch-tiled grid / parallel axis.
    big_state = jax.random.normal(k_big, (512, state_dim), jnp.float32)
    big_out = jax.block_until_ready(
        actor_forward(big_state, padded, dims, amax=amax))
    big_ref = actor_reference(big_state, params, amax=amax)
    assert big_out.shape == (512, action_dim)
    assert jnp.allclose(big_out, big_ref, rtol=5e-2, atol=1.0)

    print("KERNEL_OK")
</pallas_src>

<mosaic_0001>
module attributes {stable_mosaic.version = 11 : i64} {
  func.func @_actor_kernel(%arg0: i32, %arg1: memref<16x128xbf16, #tpu.memory_space<vmem>>, %arg2: memref<128x128xbf16, #tpu.memory_space<vmem>>, %arg3: memref<1x128xf32, #tpu.memory_space<vmem>>, %arg4: memref<128x128xbf16, #tpu.memory_space<vmem>>, %arg5: memref<1x128xf32, #tpu.memory_space<vmem>>, %arg6: memref<128x128xbf16, #tpu.memory_space<vmem>>, %arg7: memref<1x128xf32, #tpu.memory_space<vmem>>, %arg8: memref<16x128xf32, #tpu.memory_space<vmem>>) attributes {dimension_semantics = [#tpu.dimension_semantics<parallel>], iteration_bounds = array<i64: 1>, scalar_prefetch = 0 : i64, scratch_operands = 0 : i64, tpu.core_type = #tpu.core_type<tc>, window_params = [{transform_indices = @transform_0, window_bounds = array<i64: 16, 128>}, {pipeline_mode = #tpu.pipeline_mode<synchronous>, transform_indices = @transform_1, window_bounds = array<i64: 128, 128>}, {pipeline_mode = #tpu.pipeline_mode<synchronous>, transform_indices = @transform_2, window_bounds = array<i64: 1, 128>}, {pipeline_mode = #tpu.pipeline_mode<synchronous>, transform_indices = @transform_3, window_bounds = array<i64: 128, 128>}, {pipeline_mode = #tpu.pipeline_mode<synchronous>, transform_indices = @transform_4, window_bounds = array<i64: 1, 128>}, {pipeline_mode = #tpu.pipeline_mode<synchronous>, transform_indices = @transform_5, window_bounds = array<i64: 128, 128>}, {pipeline_mode = #tpu.pipeline_mode<synchronous>, transform_indices = @transform_6, window_bounds = array<i64: 1, 128>}, {transform_indices = @transform_7, window_bounds = array<i64: 16, 128>}]} {
    %c0 = arith.constant 0 : index
    %c0_0 = arith.constant 0 : index
    %0 = vector.load %arg1[%c0, %c0_0] : memref<16x128xbf16, #tpu.memory_space<vmem>>, vector<16x128xbf16>
    %c0_1 = arith.constant 0 : index
    %c0_2 = arith.constant 0 : index
    %1 = vector.load %arg2[%c0_1, %c0_2] : memref<128x128xbf16, #tpu.memory_space<vmem>>, vector<128x128xbf16>
    %cst = arith.constant dense<0.000000e+00> : vector<16x128xf32>
    %2 = tpu.matmul %0, %1, %cst {dimension_numbers = #tpu.dot_dimension_numbers<[1], [0], [0], [1], [0, 0, 1, 1], [], []>} : vector<16x128xbf16>, vector<128x128xbf16>, vector<16x128xf32> -> vector<16x128xf32>
    %c0_3 = arith.constant 0 : index
    %c0_4 = arith.constant 0 : index
    %3 = vector.load %arg3[%c0_3, %c0_4] : memref<1x128xf32, #tpu.memory_space<vmem>>, vector<1x128xf32>
    %4 = vector.broadcast %3 : vector<1x128xf32> to vector<16x128xf32>
    %5 = arith.addf %2, %4 : vector<16x128xf32>
    %cst_5 = arith.constant 0.000000e+00 : f32
    %6 = vector.broadcast %cst_5 : f32 to vector<16x128xf32>
    %7 = arith.maximumf %5, %6 : vector<16x128xf32>
    %8 = arith.truncf %7 : vector<16x128xf32> to vector<16x128xbf16>
    %c0_6 = arith.constant 0 : index
    %c0_7 = arith.constant 0 : index
    %9 = vector.load %arg4[%c0_6, %c0_7] : memref<128x128xbf16, #tpu.memory_space<vmem>>, vector<128x128xbf16>
    %cst_8 = arith.constant dense<0.000000e+00> : vector<16x128xf32>
    %10 = tpu.matmul %8, %9, %cst_8 {dimension_numbers = #tpu.dot_dimension_numbers<[1], [0], [0], [1], [0, 0, 1, 1], [], []>} : vector<16x128xbf16>, vector<128x128xbf16>, vector<16x128xf32> -> vector<16x128xf32>
    %c0_9 = arith.constant 0 : index
    %c0_10 = arith.constant 0 : index
    %11 = vector.load %arg5[%c0_9, %c0_10] : memref<1x128xf32, #tpu.memory_space<vmem>>, vector<1x128xf32>
    %12 = vector.broadcast %11 : vector<1x128xf32> to vector<16x128xf32>
    %13 = arith.addf %10, %12 : vector<16x128xf32>
    %cst_11 = arith.constant 0.000000e+00 : f32
    %14 = vector.broadcast %cst_11 : f32 to vector<16x128xf32>
    %15 = arith.maximumf %13, %14 : vector<16x128xf32>
    %16 = arith.truncf %15 : vector<16x128xf32> to vector<16x128xbf16>
    %c0_12 = arith.constant 0 : index
    %c0_13 = arith.constant 0 : index
    %17 = vector.load %arg6[%c0_12, %c0_13] : memref<128x128xbf16, #tpu.memory_space<vmem>>, vector<128x128xbf16>
    %cst_14 = arith.constant dense<0.000000e+00> : vector<16x128xf32>
    %18 = tpu.matmul %16, %17, %cst_14 {dimension_numbers = #tpu.dot_dimension_numbers<[1], [0], [0], [1], [0, 0, 1, 1], [], []>} : vector<16x128xbf16>, vector<128x128xbf16>, vector<16x128xf32> -> vector<16x128xf32>
    %c0_15 = arith.constant 0 : index
    %c0_16 = arith.constant 0 : index
    %19 = vector.load %arg7[%c0_15, %c0_16] : memref<1x128xf32, #tpu.memory_space<vmem>>, vector<1x128xf32>
    %20 = vector.broadcast %19 : vector<1x128xf32> to vector<16x128xf32>
    %21 = arith.addf %18, %20 : vector<16x128xf32>
    %22 = math.tanh %21 : vector<16x128xf32>
    %cst_17 = arith.constant 1.000000e+02 : f32
    %23 = vector.broadcast %cst_17 : f32 to vector<16x128xf32>
    %24 = arith.mulf %22, %23 : vector<16x128xf32>
    %c0_18 = arith.constant 0 : index
    %c0_19 = arith.constant 0 : index
    %25 = vector.load %arg8[%c0_18, %c0_19] : memref<16x128xf32, #tpu.memory_space<vmem>>, vector<16x128xf32>
    tpu.vector_store %arg8[%c0_18, %c0_19], %24 {strides = array<i32>} : memref<16x128xf32, #tpu.memory_space<vmem>>, vector<16x128xf32>,
    return
  }
  func.func @transform_0(%arg0: i32) -> (i32, i32) {
    %c0_i32 = arith.constant 0 : i32
    %c0_i32_0 = arith.constant 0 : i32
    return %arg0, %c0_i32 : i32, i32
  }
  func.func @transform_1(%arg0: i32) -> (i32, i32) {
    %c0_i32 = arith.constant 0 : i32
    %c0_i32_0 = arith.constant 0 : i32
    %c0_i32_1 = arith.constant 0 : i32
    return %c0_i32, %c0_i32_0 : i32, i32
  }
  func.func @transform_2(%arg0: i32) -> (i32, i32) {
    %c0_i32 = arith.constant 0 : i32
    %c0_i32_0 = arith.constant 0 : i32
    %c0_i32_1 = arith.constant 0 : i32
    return %c0_i32, %c0_i32_0 : i32, i32
  }
  func.func @transform_3(%arg0: i32) -> (i32, i32) {
    %c0_i32 = arith.constant 0 : i32
    %c0_i32_0 = arith.constant 0 : i32
    %c0_i32_1 = arith.constant 0 : i32
    return %c0_i32, %c0_i32_0 : i32, i32
  }
  func.func @transform_4(%arg0: i32) -> (i32, i32) {
    %c0_i32 = arith.constant 0 : i32
    %c0_i32_0 = arith.constant 0 : i32
    %c0_i32_1 = arith.constant 0 : i32
    return %c0_i32, %c0_i32_0 : i32, i32
  }
  func.func @transform_5(%arg0: i32) -> (i32, i32) {
    %c0_i32 = arith.constant 0 : i32
    %c0_i32_0 = arith.constant 0 : i32
    %c0_i32_1 = arith.constant 0 : i32
    return %c0_i32, %c0_i32_0 : i32, i32
  }
  func.func @transform_6(%arg0: i32) -> (i32, i32) {
    %c0_i32 = arith.constant 0 : i32
    %c0_i32_0 = arith.constant 0 : i32
    %c0_i32_1 = arith.constant 0 : i32
    return %c0_i32, %c0_i32_0 : i32, i32
  }
  func.func @transform_7(%arg0: i32) -> (i32, i32) {
    %c0_i32 = arith.constant 0 : i32
    %c0_i32_0 = arith.constant 0 : i32
    return %arg0, %c0_i32 : i32, i32
  }
}

</mosaic_0001>

<bundles_post_ra>
// kernel: actor_forward.1
= control target key start
LH: loop header
LB: loop body
LE: loop exit
PB: predicated region body
PF: predicated region fallthrough
CT: control target
= control target key end

     0   :  { %12 = vsyncpa [#allocation3], 0  ;;  %s798_s0 = inlined_call_operand.vmem [shape: bf16[16,128], index: 0, kind: input, shape index: {}]   ;;  %s799_s1 = inlined_call_operand.hbm [shape: bf16[128,128], index: 1, kind: input, shape index: {}]   ;;  %s800_s2 = inlined_call_operand.vmem [shape: f32[1,128], index: 2, kind: input, shape index: {}]   ;;  %s801_s3 = inlined_call_operand.hbm [shape: bf16[128,128], index: 3, kind: input, shape index: {}]   ;;  %s802_s4 = inlined_call_operand.vmem [shape: f32[1,128], index: 4, kind: input, shape index: {}]   ;;  %s803_s5 = inlined_call_operand.hbm [shape: bf16[128,128], index: 5, kind: input, shape index: {}]   ;;  %s804_s6 = inlined_call_operand.vmem [shape: f32[1,128], index: 6, kind: input, shape index: {}]   ;;  %s805_s7 = inlined_call_operand.vmem [shape: f32[16,128], index: 7, kind: output, shape index: {}]  }
   0x1   :  { %13 = vsyncpa [#allocation5], 0  ;;  %s651_s24 = smov [#allocation4]   ;;  %s652_s26 = smov [#allocation2]  }
   0x2   :  { %s35_s25 = sshll.u32 %s651_s24, 4  ;;  %s21_s27 = sshll.u32 %s652_s26, 4  ;;  %s36_s25 = int_to_ptr.vmem [resolvable:$true] %s35_s25  ;;  %s698_s27 = int_to_ptr.vmem [resolvable:$true] %s21_s27 }
   0x3   :  { %s581_s30 = scalar_lea.hbm %s801_s3, 1024 }
   0x4   :  { %p582_p0 = scmp.ne.s32.totalorder %s801_s3, %s581_s30  ;;  %p585_p1 = scmp.lt.u32.totalorder %s581_s30, %s801_s3 }
   0x6   :  { %p587_p2 = pnand %p585_p1, %p582_p0 }
   0x8   :  { %590 = shalt.err (!%p587_p2)
}
   0x9   :  { %s591_s12 = scalar_lea.vmem %s36_s25, 1024  ;;  %p596_p4 = scmp.lt.s32.totalorder %s36_s25, %s36_s25 }
   0xa   :  { %p592_p3 = scmp.ne.s32.totalorder %s36_s25, %s591_s12  ;;  %p597_p5 = scmp.lt.s32.totalorder %s591_s12, %s591_s12 }
   0xc   :  { %p598_p6 = por %p597_p5, %p596_p4 }
   0xe   :  { %p599_p7 = pnand %p598_p6, %p592_p3 }
  0x10   :  { %602 = shalt.err (!%p599_p7)
}
  0x11   :  { %s653_s13 = smov 64   ;;  %s654_s14 = smov 4  }
  0x12   :  { %41 = dma.hbm_to_vmem [thread:$0]  %s801_s3, 1024, %s36_s25, [#allocation5], %s653_s13, %s653_s13, %s654_s14  }
  0x13   :  { %s603_s19 = scalar_lea.hbm %s799_s1, 1024 }
  0x14   :  { %p604_p8 = scmp.ne.s32.totalorder %s799_s1, %s603_s19  ;;  %p607_p9 = scmp.lt.u32.totalorder %s603_s19, %s799_s1 }
  0x16   :  { %p609_p10 = pnand %p607_p9, %p604_p8 }
  0x18   :  { %612 = shalt.err (!%p609_p10)
}
  0x19   :  { %s613_s24 = scalar_lea.vmem %s698_s27, 1024  ;;  %p618_p12 = scmp.lt.s32.totalorder %s698_s27, %s698_s27 }
  0x1a   :  { %p614_p11 = scmp.ne.s32.totalorder %s698_s27, %s613_s24  ;;  %p619_p13 = scmp.lt.s32.totalorder %s613_s24, %s613_s24 }
  0x1c   :  { %p620_p0 = por %p619_p13, %p618_p12 }
  0x1e   :  { %p621_p1 = pnand %p620_p0, %p614_p11 }
  0x20   :  { %624 = shalt.err (!%p621_p1)
}
  0x21   :  { %27 = dma.hbm_to_vmem [thread:$0]  %s799_s1, 1024, %s698_s27, [#allocation3], %s653_s13, %s653_s13, %s654_s14  }
  0x22   :  { %s655_s26 = smov [#allocation6]   ;;  %s625_s8 = scalar_lea.hbm %s803_s5, 1024 }
  0x23   :  { %s49_s28 = sshll.u32 %s655_s26, 4  ;;  %p626_p2 = scmp.ne.s32.totalorder %s803_s5, %s625_s8  ;;  %s50_s28 = int_to_ptr.vmem [resolvable:$true] %s49_s28 }
  0x24   :  { %p629_p3 = scmp.lt.u32.totalorder %s625_s8, %s803_s5 }
  0x26   :  { %p631_p4 = pnand %p629_p3, %p626_p2 }
  0x28   :  { %634 = shalt.err (!%p631_p4)
}
  0x29   :  { %s635_s15 = scalar_lea.vmem %s50_s28, 1024  ;;  %p640_p6 = scmp.lt.s32.totalorder %s50_s28, %s50_s28 }
  0x2a   :  { %p636_p5 = scmp.ne.s32.totalorder %s50_s28, %s635_s15  ;;  %p641_p7 = scmp.lt.s32.totalorder %s635_s15, %s635_s15 }
  0x2c   :  { %p642_p8 = por %p641_p7, %p640_p6 }
  0x2e   :  { %p643_p9 = pnand %p642_p8, %p636_p5 }
  0x30   :  { %646 = shalt.err (!%p643_p9)
}
  0x31   :  { %55 = dma.hbm_to_vmem [thread:$0]  %s803_s5, 1024, %s50_s28, [#allocation5], %s653_s13, %s653_s13, %s654_s14  }
  0x32   :  { %647 = dma.done.wait [#allocation3], 1024  }
  0x33   :  { %648 = vsyncadd [#allocation3], 4294966272 }
  0x34   :  { %649 = dma.done.wait [#allocation5], 2048  }
  0x35   :  { %650 = vsyncadd [#allocation5], 4294965248  ;;  %v656_v0 = vmov 0.0   ;;  %vm657_vm0 = vmmov 0   ;;  %v552_v1 = vld [vmem:[#allocation2] sm:$0xff]   ;;  %v553_v2 = vld [vmem:[#allocation2 + $0x8] sm:$0xff]  }
  0x36   :  { %485 = vmatprep.subr.bf16.mxu0 %v656_v0  ;;  %501 = vmatprep.mubr.msk.bf16.mxu0 %vm657_vm0, %v656_v0  ;;  %v554_v3 = vld [vmem:[#allocation2 + $0x10] sm:$0xff]   ;;  %v561_v4 = vld [vmem:[#allocation4] sm:$0xff]   ;;  %v555_v5 = vld [vmem:[#allocation2 + $0x18] sm:$0xff]  }
  0x37   :  { %505 = vmatprep.subr.bf16.mxu1 %v656_v0  ;;  %521 = vmatprep.mubr.msk.bf16.mxu1 %vm657_vm0, %v656_v0  ;;  %v562_v6 = vld [vmem:[#allocation4 + $0x8] sm:$0xff]   ;;  %v556_v7 = vld [vmem:[#allocation2 + $0x20] sm:$0xff]   ;;  %v563_v8 = vld [vmem:[#allocation4 + $0x10] sm:$0xff]  }
  0x38   :  { %486 = vmatpush3.bf16.msra.mxu0 %v552_v1  ;;  %506 = vmatpush3.bf16.msra.mxu1 %v561_v4  ;;  %v557_v9 = vld [vmem:[#allocation2 + $0x28] sm:$0xff]   ;;  %v564_v10 = vld [vmem:[#allocation4 + $0x18] sm:$0xff]   ;;  %v558_v11 = vld [vmem:[#allocation2 + $0x30] sm:$0xff]  }
  0x39   :  { %487 = vmatprep.subr.bf16.mxu0 %v656_v0  ;;  %507 = vmatprep.subr.bf16.mxu1 %v656_v0  ;;  %v565_v12 = vld [vmem:[#allocation4 + $0x20] sm:$0xff]   ;;  %v559_v13 = vld [vmem:[#allocation2 + $0x38] sm:$0xff]   ;;  %v566_v14 = vld [vmem:[#allocation4 + $0x28] sm:$0xff]  }
  0x3a   :  { %v560_v15 = vld [vmem:[%s798_s0] sm:$0xff]   ;;  %v567_v16 = vld [vmem:[#allocation4 + $0x30] sm:$0xff]   ;;  %v568_v17 = vld [vmem:[#allocation4 + $0x38] sm:$0xff]  }
  0x3b   :  { %v569_v18 = vld [vmem:[#allocation6] sm:$0xff]   ;;  %v570_v19 = vld [vmem:[#allocation6 + $0x8] sm:$0xff]   ;;  %v571_v20 = vld [vmem:[#allocation6 + $0x10] sm:$0xff]  }
  0x3c   :  { %488 = vmatpush3.bf16.msra.mxu0 %v553_v2  ;;  %508 = vmatpush3.bf16.msra.mxu1 %v562_v6  ;;  %v572_v21 = vld [vmem:[#allocation6 + $0x18] sm:$0xff]   ;;  %v573_v22 = vld [vmem:[#allocation6 + $0x20] sm:$0xff]   ;;  %v574_v23 = vld [vmem:[#allocation6 + $0x28] sm:$0xff]  }
  0x3d   :  { %489 = vmatprep.subr.bf16.mxu0 %v656_v0  ;;  %509 = vmatprep.subr.bf16.mxu1 %v656_v0  ;;  %v430_v24 = vld [vmem:[%s800_s2] ss:$0 sm:$0xff]  ;;  %v575_v34 = vld [vmem:[#allocation6 + $0x30] sm:$0xff]   ;;  %v576_v35 = vld [vmem:[#allocation6 + $0x38] sm:$0xff]  }
  0x3e   :  { %v440_v36 = vld [vmem:[%s802_s4] ss:$0 sm:$0xff] }
  0x3f   :  { %v449_v46 = vld [vmem:[%s804_s6] ss:$0 sm:$0xff] }
  0x40   :  { %490 = vmatpush3.bf16.msra.mxu0 %v554_v3  ;;  %510 = vmatpush3.bf16.msra.mxu1 %v563_v8 }
  0x41   :  { %491 = vmatprep.subr.bf16.mxu0 %v656_v0  ;;  %511 = vmatprep.subr.bf16.mxu1 %v656_v0 }
  0x44   :  { %492 = vmatpush3.bf16.msra.mxu0 %v555_v5  ;;  %512 = vmatpush3.bf16.msra.mxu1 %v564_v10 }
  0x45   :  { %493 = vmatprep.subr.bf16.mxu0 %v656_v0  ;;  %513 = vmatprep.subr.bf16.mxu1 %v656_v0 }
  0x48   :  { %494 = vmatpush3.bf16.msra.mxu0 %v556_v7  ;;  %514 = vmatpush3.bf16.msra.mxu1 %v565_v12 }
  0x49   :  { %495 = vmatprep.subr.bf16.mxu0 %v656_v0  ;;  %515 = vmatprep.subr.bf16.mxu1 %v656_v0 }
  0x4c   :  { %496 = vmatpush3.bf16.msra.mxu0 %v557_v9  ;;  %516 = vmatpush3.bf16.msra.mxu1 %v566_v14 }
  0x4d   :  { %497 = vmatprep.subr.bf16.mxu0 %v656_v0  ;;  %517 = vmatprep.subr.bf16.mxu1 %v656_v0 }
  0x50   :  { %498 = vmatpush3.bf16.msra.mxu0 %v558_v11  ;;  %518 = vmatpush3.bf16.msra.mxu1 %v567_v16 }
  0x51   :  { %499 = vmatprep.subr.bf16.mxu0 %v656_v0  ;;  %519 = vmatprep.subr.bf16.mxu1 %v656_v0 }
  0x54   :  { %500 = vmatpush3.bf16.msra.mxu0 %v559_v13  ;;  %520 = vmatpush3.bf16.msra.mxu1 %v568_v17 }
  0x55   :  { %525 = vmatprep.subr.bf16.mxu0 %v656_v0 }
  0x57   :  { %502 = vmatmul.mubr.bf16.vlgmr.msra.gmra.mrb[0].mxu0 %v560_v15 }
  0x58   :  { %541 = vmatprep.mubr.msk.bf16.mxu0 %vm657_vm0, %v656_v0  ;;  %526 = vmatpush3.bf16.msra.mxu0 %v569_v18 }
  0x59   :  { %527 = vmatprep.subr.bf16.mxu0 %v656_v0 }
  0x5c   :  { %528 = vmatpush3.bf16.msra.mxu0 %v570_v19 }
  0x5d   :  { %529 = vmatprep.subr.bf16.mxu0 %v656_v0 }
  0x60   :  { %530 = vmatpush3.bf16.msra.mxu0 %v571_v20 }
  0x61   :  { %531 = vmatprep.subr.bf16.mxu0 %v656_v0 }
  0x64   :  { %532 = vmatpush3.bf16.msra.mxu0 %v572_v21 }
  0x65   :  { %533 = vmatprep.subr.bf16.mxu0 %v656_v0 }
  0x68   :  { %534 = vmatpush3.bf16.msra.mxu0 %v573_v22 }
  0x69   :  { %535 = vmatprep.subr.bf16.mxu0 %v656_v0 }
  0x6c   :  { %536 = vmatpush3.bf16.msra.mxu0 %v574_v23 }
  0x6d   :  { %537 = vmatprep.subr.bf16.mxu0 %v656_v0 }
  0x70   :  { %538 = vmatpush3.bf16.msra.mxu0 %v575_v34 }
  0x71   :  { %539 = vmatprep.subr.bf16.mxu0 %v656_v0 }
  0x74   :  { %540 = vmatpush3.bf16.msra.mxu0 %v576_v35 }
 0x12a   :  { %v181_v25 = vpop.f32.mrb[0].mxu0 }
 0x12b   :  { %v182_v26 = vadd.f32 %v430_v24, %v181_v25  ;;  %v503_v27 = vpop.f32.mrb[1].mxu0 }
 0x12c   :  { %v184_v28 = vpop.f32.mrb[2].mxu0 }
 0x12d   :  { %v185_v29 = vadd.f32 %v430_v24, %v184_v28  ;;  %v504_v30 = vpop.f32.mrb[3].mxu0  ;;  %v188_v31 = vmax.f32 %v182_v26, 0.0 }
 0x12f   :  { %v189_v32 = vmax.f32 %v185_v29, 0.0 }
 0x131   :  { %v190_v33 = vpack.c.bf16 %v189_v32, %v188_v31 }
 0x133   :  { %522 = vmatmul.mubr.bf16.vlgmr.msra.gmra.mrb[0].mxu1 %v190_v33 }
 0x206   :  { %v296_v37 = vpop.f32.mrb[0].mxu1 }
 0x207   :  { %v297_v38 = vadd.f32 %v440_v36, %v296_v37  ;;  %v523_v39 = vpop.f32.mrb[1].mxu1 }
 0x208   :  { %v299_v40 = vpop.f32.mrb[2].mxu1 }
 0x209   :  { %v300_v41 = vadd.f32 %v440_v36, %v299_v40  ;;  %v524_v42 = vpop.f32.mrb[3].mxu1  ;;  %v303_v43 = vmax.f32 %v297_v38, 0.0 }
 0x20b   :  { %v304_v44 = vmax.f32 %v300_v41, 0.0 }
 0x20d   :  { %v305_v45 = vpack.c.bf16 %v304_v44, %v303_v43 }
 0x20f   :  { %542 = vmatmul.mubr.bf16.vlgmr.msra.gmra.mrb[4].mxu0 %v305_v45 }
 0x2e2   :  { %v411_v47 = vpop.f32.mrb[4].mxu0 }
 0x2e3   :  { %v412_v48 = vadd.f32 %v449_v46, %v411_v47  ;;  %v543_v49 = vpop.f32.mrb[5].mxu0 }
 0x2e4   :  { %v414_v50 = vpop.f32.mrb[6].mxu0 }
 0x2e5   :  { %577 = vtanh.f32 %v412_v48  ;;  %v415_v51 = vadd.f32 %v449_v46, %v414_v50  ;;  %v544_v52 = vpop.f32.mrb[7].mxu0 }
 0x2e7   :  { %579 = vtanh.f32 %v415_v51 }
 0x2ef   :  { %v578_v53 = vpop.eup %577 }
 0x2f0   :  { %v420_v54 = vmul.f32 100.0, %v578_v53 }
 0x2f1   :  { %v580_v55 = vpop.eup %579 }
 0x2f2   :  { %422 = vst [vmem:[%s805_s7] sm:$0xff] %v420_v54  ;;  %v421_v56 = vmul.f32 100.0, %v580_v55 }
 0x2f4   :  { %423 = vst [vmem:[%s805_s7 + $0x8] sm:$0xff] %v421_v56 }
 0x2f5   :  { %428 = vsyncpa [#allocation3], 1 }
 0x2f6   :  { %429 = vsyncpa [#allocation5], 1 }

</bundles_post_ra>
